<compile_context>
chip_gen: v7x
topology: tpu7x:2x2x1
jax: 0.10.0
libtpu: 0.0.40
codegen_flags: <defaults>
</compile_context>

<pallas_src>
import functools

import jax
import jax.numpy as jnp
from jax.experimental import pallas as pl
from jax.experimental.pallas import tpu as pltpu


D = 128  # lane-dense packed (padded) uniform layer width


# ---------------------------------------------------------------------------
# Fused TURL forward kernel (all three MLPs in one kernel body)
# ---------------------------------------------------------------------------
def _make_turl_kernel(relu_flags, capture_layers):
    """Build the fused kernel.

    relu_flags[l]   : apply ReLU after global linear layer l (hidden layers only).
    capture_layers  : global layer indices whose outputs are z1, z2, z3.
    Ref order: x (TB, D), w_slab (L, D, D), b_slab (L, D), out_slab (TB, n_out*D).
    """
    n_layers = len(relu_flags)
    slot = {layer: k for k, layer in enumerate(capture_layers)}

    def kernel(x_ref, w_ref, b_ref, out_ref):
        h = x_ref[...]                                   # (TB, D) f32
        # Fully unrolled layer chain; h stays in vregs the whole time.
        for l in range(n_layers):
            h = jnp.dot(h, w_ref[l], preferred_element_type=jnp.float32)
            h = h + b_ref[l:l + 1, :]
            if relu_flags[l]:
                h = jnp.maximum(h, 0.0)                  # rtdl.MLP hidden activation
            if l in slot:
                k = slot[l]
                out_ref[:, k * D:(k + 1) * D] = h        # lane-aligned 128-wide store

    return kernel


# ---------------------------------------------------------------------------
# JAX wrapper
# ---------------------------------------------------------------------------
def turl_forward(x_num, x_cat, w_slab, b_slab, layout, block_b=256):
    """TURLModel.forward (head=False, n_decoder=n_predictor=1): returns (z1, z2, z3)."""
    # Fold the feature concat into the wrapper; zero-pad features to D
    # (W0's padded rows are zero, so this is mathematically exact).
    x = x_num if x_cat is None else jnp.concatenate([x_num, x_cat], axis=1)
    B, d_in = x.shape
    x = jnp.pad(x, ((0, 0), (0, D - d_in)))

    # Batch tile: >= 8 sublanes, capped at block_b; pad batch to a multiple.
    TB = min(block_b, max(8, ((B + 7) // 8) * 8))
    B_pad = ((B + TB - 1) // TB) * TB
    if B_pad != B:
        x = jnp.pad(x, ((0, B_pad - B), (0, 0)))

    L = w_slab.shape[0]
    n_out = len(layout["capture"])
    out_w = n_out * D                                    # 384: lane-dense slab

    kernel = _make_turl_kernel(layout["relu"], layout["capture"])

    out = pl.pallas_call(
        kernel,
        grid=(B_pad // TB,),
        in_specs=[
            pl.BlockSpec((TB, D), lambda i: (i, 0)),          # batch-tiled input
            pl.BlockSpec((L, D, D), lambda i: (0, 0, 0)),     # weights resident
            pl.BlockSpec((L, D), lambda i: (0, 0)),           # biases resident
        ],
        out_specs=pl.BlockSpec((TB, out_w), lambda i: (i, 0)),
        out_shape=jax.ShapeDtypeStruct((B_pad, out_w), jnp.float32),
        compiler_params=pltpu.CompilerParams(
            dimension_semantics=("parallel",)),               # megacore on v7x
    )(x, w_slab, b_slab)

    # Slice z1, z2, z3 out of the lane-dense slab (lane-aligned slices).
    return tuple(out[:B, k * D:k * D + d]
                 for k, d in enumerate(layout["d_outs"]))


# ---------------------------------------------------------------------------
# Parameter construction & packing
# ---------------------------------------------------------------------------
def init_mlp_params(key, d_in, d_layers, d_out):
    """Linear layers d_in -> d_layers[0] -> ... -> d_layers[-1] -> d_out."""
    dims = [d_in] + list(d_layers) + [d_out]
    weights, biases = [], []
    for i in range(len(dims) - 1):
        key, kw, kb = jax.random.split(key, 3)
        scale = 1.0 / jnp.sqrt(jnp.float32(dims[i]))
        w = jax.random.uniform(kw, (dims[i], dims[i + 1]), jnp.float32, -scale, scale)
        b = jax.random.uniform(kb, (1, dims[i + 1]), jnp.float32, -scale, scale)
        weights.append(w)
        biases.append(b)
    return weights, biases, key


def pack_turl_params(mlp_params):
    """Pack [(enc_w, enc_b), (dec_w, dec_b), (pred_w, pred_b)] into two slabs.

    Weights are zero-padded to a uniform (D, D) = (128, 128); zero padding
    propagates exact zeros through linear(+zero bias)+ReLU layers, so padded
    lanes never contaminate results.
    """
    all_w = [w for ws, _ in mlp_params for w in ws]
    all_b = [jnp.reshape(b, (-1,)) for _, bs in mlp_params for b in bs]
    assert max(max(w.shape[0], w.shape[1]) for w in all_w) <= D, \
        "layer width exceeds packed lane-dense width D=128"
    L = len(all_w)

    w_slab = jnp.zeros((L, D, D), jnp.float32)
    b_slab = jnp.zeros((L, D), jnp.float32)
    for l, (w, b) in enumerate(zip(all_w, all_b)):
        w_slab = w_slab.at[l, :w.shape[0], :w.shape[1]].set(w)
        b_slab = b_slab.at[l, :b.shape[0]].set(b)

    relu_flags, capture, d_outs = [], [], []
    idx = 0
    for ws, _ in mlp_params:
        n = len(ws)
        relu_flags.extend([True] * (n - 1) + [False])   # no activation on the head
        idx += n
        capture.append(idx - 1)
        d_outs.append(ws[-1].shape[1])

    layout = dict(relu=tuple(relu_flags), capture=tuple(capture),
                  d_outs=tuple(d_outs))
    return w_slab, b_slab, layout


# ---------------------------------------------------------------------------
# Pure-JAX reference for verification
# ---------------------------------------------------------------------------
def mlp_ref(x, weights, biases):
    h = x
    n = len(weights)
    for l, (w, b) in enumerate(zip(weights, biases)):
        h = h @ w + b
        if l < n - 1:
            h = jnp.maximum(h, 0.0)
    return h


if __name__ == "__main__":
    # batch=8, 16 numeric + 16 categorical features -> encoder d_in = 32
    B, d_num, d_cat = 8, 16, 16
    d_hidden, d_out = 32, 32

    key = jax.random.PRNGKey(0)
    key, kx1, kx2 = jax.random.split(key, 3)
    x_num = jax.random.normal(kx1, (B, d_num), jnp.float32)
    x_cat = jax.random.normal(kx2, (B, d_cat), jnp.float32)

    enc_w, enc_b, key = init_mlp_params(key, d_num + d_cat, [d_hidden] * 3, d_out)
    dec_w, dec_b, key = init_mlp_params(key, d_out, [d_hidden] * 2, d_out)
    prd_w, prd_b, key = init_mlp_params(key, d_out, [d_hidden] * 2, d_out)

    w_slab, b_slab, layout = pack_turl_params(
        [(enc_w, enc_b), (dec_w, dec_b), (prd_w, prd_b)])

    fwd = jax.jit(functools.partial(turl_forward, layout=layout))
    z1, z2, z3 = fwd(x_num, x_cat, w_slab, b_slab)
    jax.block_until_ready((z1, z2, z3))

    # verify against pure-JAX reference
    x = jnp.concatenate([x_num, x_cat], axis=1)
    z1_ref = mlp_ref(x, enc_w, enc_b)
    z2_ref = mlp_ref(z1_ref, dec_w, dec_b)
    z3_ref = mlp_ref(z2_ref, prd_w, prd_b)

    assert jnp.allclose(z1, z1_ref, atol=1e-5, rtol=1e-5)
    assert jnp.allclose(z2, z2_ref, atol=1e-5, rtol=1e-5)
    assert jnp.allclose(z3, z3_ref, atol=1e-5, rtol=1e-5)

    print("KERNEL_OK")
</pallas_src>

<mosaic_0001>
module attributes {stable_mosaic.version = 11 : i64} {
  func.func @kernel(%arg0: i32, %arg1: memref<8x128xf32, #tpu.memory_space<vmem>>, %arg2: memref<10x128x128xf32, #tpu.memory_space<vmem>>, %arg3: memref<10x128xf32, #tpu.memory_space<vmem>>, %arg4: memref<8x384xf32, #tpu.memory_space<vmem>>) attributes {dimension_semantics = [#tpu.dimension_semantics<parallel>], iteration_bounds = array<i64: 1>, scalar_prefetch = 0 : i64, scratch_operands = 0 : i64, tpu.core_type = #tpu.core_type<tc>, window_params = [{transform_indices = @transform_0, window_bounds = array<i64: 8, 128>}, {pipeline_mode = #tpu.pipeline_mode<synchronous>, transform_indices = @transform_1, window_bounds = array<i64: 10, 128, 128>}, {pipeline_mode = #tpu.pipeline_mode<synchronous>, transform_indices = @transform_2, window_bounds = array<i64: 10, 128>}, {transform_indices = @transform_3, window_bounds = array<i64: 8, 384>}]} {
    %c0 = arith.constant 0 : index
    %c0_0 = arith.constant 0 : index
    %0 = vector.load %arg1[%c0, %c0_0] : memref<8x128xf32, #tpu.memory_space<vmem>>, vector<8x128xf32>
    %c0_1 = arith.constant 0 : index
    %c0_2 = arith.constant 0 : index
    %c0_3 = arith.constant 0 : index
    %1 = vector.load %arg2[%c0_1, %c0_2, %c0_3] : memref<10x128x128xf32, #tpu.memory_space<vmem>>, vector<1x128x128xf32>
    %2 = vector.shape_cast %1 : vector<1x128x128xf32> to vector<128x128xf32>
    %cst = arith.constant dense<0.000000e+00> : vector<8x128xf32>
    %3 = tpu.matmul %0, %2, %cst {dimension_numbers = #tpu.dot_dimension_numbers<[1], [0], [0], [1], [0, 0, 1, 1], [], []>} : vector<8x128xf32>, vector<128x128xf32>, vector<8x128xf32> -> vector<8x128xf32>
    %c0_4 = arith.constant 0 : index
    %c0_5 = arith.constant 0 : index
    %4 = vector.load %arg3[%c0_4, %c0_5] : memref<10x128xf32, #tpu.memory_space<vmem>>, vector<1x128xf32>
    %5 = vector.broadcast %4 : vector<1x128xf32> to vector<8x128xf32>
    %6 = arith.addf %3, %5 : vector<8x128xf32>
    %cst_6 = arith.constant 0.000000e+00 : f32
    %7 = vector.broadcast %cst_6 : f32 to vector<8x128xf32>
    %8 = arith.maximumf %6, %7 : vector<8x128xf32>
    %c1 = arith.constant 1 : index
    %c0_7 = arith.constant 0 : index
    %c0_8 = arith.constant 0 : index
    %9 = vector.load %arg2[%c1, %c0_7, %c0_8] : memref<10x128x128xf32, #tpu.memory_space<vmem>>, vector<1x128x128xf32>
    %10 = vector.shape_cast %9 : vector<1x128x128xf32> to vector<128x128xf32>
    %cst_9 = arith.constant dense<0.000000e+00> : vector<8x128xf32>
    %11 = tpu.matmul %8, %10, %cst_9 {dimension_numbers = #tpu.dot_dimension_numbers<[1], [0], [0], [1], [0, 0, 1, 1], [], []>} : vector<8x128xf32>, vector<128x128xf32>, vector<8x128xf32> -> vector<8x128xf32>
    %c1_10 = arith.constant 1 : index
    %c0_11 = arith.constant 0 : index
    %12 = vector.load %arg3[%c1_10, %c0_11] : memref<10x128xf32, #tpu.memory_space<vmem>>, vector<1x128xf32>
    %13 = vector.broadcast %12 : vector<1x128xf32> to vector<8x128xf32>
    %14 = arith.addf %11, %13 : vector<8x128xf32>
    %cst_12 = arith.constant 0.000000e+00 : f32
    %15 = vector.broadcast %cst_12 : f32 to vector<8x128xf32>
    %16 = arith.maximumf %14, %15 : vector<8x128xf32>
    %c2 = arith.constant 2 : index
    %c0_13 = arith.constant 0 : index
    %c0_14 = arith.constant 0 : index
    %17 = vector.load %arg2[%c2, %c0_13, %c0_14] : memref<10x128x128xf32, #tpu.memory_space<vmem>>, vector<1x128x128xf32>
    %18 = vector.shape_cast %17 : vector<1x128x128xf32> to vector<128x128xf32>
    %cst_15 = arith.constant dense<0.000000e+00> : vector<8x128xf32>
    %19 = tpu.matmul %16, %18, %cst_15 {dimension_numbers = #tpu.dot_dimension_numbers<[1], [0], [0], [1], [0, 0, 1, 1], [], []>} : vector<8x128xf32>, vector<128x128xf32>, vector<8x128xf32> -> vector<8x128xf32>
    %c2_16 = arith.constant 2 : index
    %c0_17 = arith.constant 0 : index
    %20 = vector.load %arg3[%c2_16, %c0_17] : memref<10x128xf32, #tpu.memory_space<vmem>>, vector<1x128xf32>
    %21 = vector.broadcast %20 : vector<1x128xf32> to vector<8x128xf32>
    %22 = arith.addf %19, %21 : vector<8x128xf32>
    %cst_18 = arith.constant 0.000000e+00 : f32
    %23 = vector.broadcast %cst_18 : f32 to vector<8x128xf32>
    %24 = arith.maximumf %22, %23 : vector<8x128xf32>
    %c3 = arith.constant 3 : index
    %c0_19 = arith.constant 0 : index
    %c0_20 = arith.constant 0 : index
    %25 = vector.load %arg2[%c3, %c0_19, %c0_20] : memref<10x128x128xf32, #tpu.memory_space<vmem>>, vector<1x128x128xf32>
    %26 = vector.shape_cast %25 : vector<1x128x128xf32> to vector<128x128xf32>
    %cst_21 = arith.constant dense<0.000000e+00> : vector<8x128xf32>
    %27 = tpu.matmul %24, %26, %cst_21 {dimension_numbers = #tpu.dot_dimension_numbers<[1], [0], [0], [1], [0, 0, 1, 1], [], []>} : vector<8x128xf32>, vector<128x128xf32>, vector<8x128xf32> -> vector<8x128xf32>
    %c3_22 = arith.constant 3 : index
    %c0_23 = arith.constant 0 : index
    %28 = vector.load %arg3[%c3_22, %c0_23] : memref<10x128xf32, #tpu.memory_space<vmem>>, vector<1x128xf32>
    %29 = vector.broadcast %28 : vector<1x128xf32> to vector<8x128xf32>
    %30 = arith.addf %27, %29 : vector<8x128xf32>
    %c0_24 = arith.constant 0 : index
    %c0_25 = arith.constant 0 : index
    %31 = vector.load %arg4[%c0_24, %c0_25] : memref<8x384xf32, #tpu.memory_space<vmem>>, vector<8x128xf32>
    tpu.vector_store %arg4[%c0_24, %c0_25], %30 {strides = array<i32>} : memref<8x384xf32, #tpu.memory_space<vmem>>, vector<8x128xf32>,
    %c4 = arith.constant 4 : index
    %c0_26 = arith.constant 0 : index
    %c0_27 = arith.constant 0 : index
    %32 = vector.load %arg2[%c4, %c0_26, %c0_27] : memref<10x128x128xf32, #tpu.memory_space<vmem>>, vector<1x128x128xf32>
    %33 = vector.shape_cast %32 : vector<1x128x128xf32> to vector<128x128xf32>
    %cst_28 = arith.constant dense<0.000000e+00> : vector<8x128xf32>
    %34 = tpu.matmul %30, %33, %cst_28 {dimension_numbers = #tpu.dot_dimension_numbers<[1], [0], [0], [1], [0, 0, 1, 1], [], []>} : vector<8x128xf32>, vector<128x128xf32>, vector<8x128xf32> -> vector<8x128xf32>
    %c4_29 = arith.constant 4 : index
    %c0_30 = arith.constant 0 : index
    %35 = vector.load %arg3[%c4_29, %c0_30] : memref<10x128xf32, #tpu.memory_space<vmem>>, vector<1x128xf32>
    %36 = vector.broadcast %35 : vector<1x128xf32> to vector<8x128xf32>
    %37 = arith.addf %34, %36 : vector<8x128xf32>
    %cst_31 = arith.constant 0.000000e+00 : f32
    %38 = vector.broadcast %cst_31 : f32 to vector<8x128xf32>
    %39 = arith.maximumf %37, %38 : vector<8x128xf32>
    %c5 = arith.constant 5 : index
    %c0_32 = arith.constant 0 : index
    %c0_33 = arith.constant 0 : index
    %40 = vector.load %arg2[%c5, %c0_32, %c0_33] : memref<10x128x128xf32, #tpu.memory_space<vmem>>, vector<1x128x128xf32>
    %41 = vector.shape_cast %40 : vector<1x128x128xf32> to vector<128x128xf32>
    %cst_34 = arith.constant dense<0.000000e+00> : vector<8x128xf32>
    %42 = tpu.matmul %39, %41, %cst_34 {dimension_numbers = #tpu.dot_dimension_numbers<[1], [0], [0], [1], [0, 0, 1, 1], [], []>} : vector<8x128xf32>, vector<128x128xf32>, vector<8x128xf32> -> vector<8x128xf32>
    %c5_35 = arith.constant 5 : index
    %c0_36 = arith.constant 0 : index
    %43 = vector.load %arg3[%c5_35, %c0_36] : memref<10x128xf32, #tpu.memory_space<vmem>>, vector<1x128xf32>
    %44 = vector.broadcast %43 : vector<1x128xf32> to vector<8x128xf32>
    %45 = arith.addf %42, %44 : vector<8x128xf32>
    %cst_37 = arith.constant 0.000000e+00 : f32
    %46 = vector.broadcast %cst_37 : f32 to vector<8x128xf32>
    %47 = arith.maximumf %45, %46 : vector<8x128xf32>
    %c6 = arith.constant 6 : index
    %c0_38 = arith.constant 0 : index
    %c0_39 = arith.constant 0 : index
    %48 = vector.load %arg2[%c6, %c0_38, %c0_39] : memref<10x128x128xf32, #tpu.memory_space<vmem>>, vector<1x128x128xf32>
    %49 = vector.shape_cast %48 : vector<1x128x128xf32> to vector<128x128xf32>
    %cst_40 = arith.constant dense<0.000000e+00> : vector<8x128xf32>
    %50 = tpu.matmul %47, %49, %cst_40 {dimension_numbers = #tpu.dot_dimension_numbers<[1], [0], [0], [1], [0, 0, 1, 1], [], []>} : vector<8x128xf32>, vector<128x128xf32>, vector<8x128xf32> -> vector<8x128xf32>
    %c6_41 = arith.constant 6 : index
    %c0_42 = arith.constant 0 : index
    %51 = vector.load %arg3[%c6_41, %c0_42] : memref<10x128xf32, #tpu.memory_space<vmem>>, vector<1x128xf32>
    %52 = vector.broadcast %51 : vector<1x128xf32> to vector<8x128xf32>
    %53 = arith.addf %50, %52 : vector<8x128xf32>
    %c0_43 = arith.constant 0 : index
    %c128 = arith.constant 128 : index
    %54 = vector.load %arg4[%c0_43, %c128] : memref<8x384xf32, #tpu.memory_space<vmem>>, vector<8x128xf32>
    tpu.vector_store %arg4[%c0_43, %c128], %53 {strides = array<i32>} : memref<8x384xf32, #tpu.memory_space<vmem>>, vector<8x128xf32>,
    %c7 = arith.constant 7 : index
    %c0_44 = arith.constant 0 : index
    %c0_45 = arith.constant 0 : index
    %55 = vector.load %arg2[%c7, %c0_44, %c0_45] : memref<10x128x128xf32, #tpu.memory_space<vmem>>, vector<1x128x128xf32>
    %56 = vector.shape_cast %55 : vector<1x128x128xf32> to vector<128x128xf32>
    %cst_46 = arith.constant dense<0.000000e+00> : vector<8x128xf32>
    %57 = tpu.matmul %53, %56, %cst_46 {dimension_numbers = #tpu.dot_dimension_numbers<[1], [0], [0], [1], [0, 0, 1, 1], [], []>} : vector<8x128xf32>, vector<128x128xf32>, vector<8x128xf32> -> vector<8x128xf32>
    %c7_47 = arith.constant 7 : index
    %c0_48 = arith.constant 0 : index
    %58 = vector.load %arg3[%c7_47, %c0_48] : memref<10x128xf32, #tpu.memory_space<vmem>>, vector<1x128xf32>
    %59 = vector.broadcast %58 : vector<1x128xf32> to vector<8x128xf32>
    %60 = arith.addf %57, %59 : vector<8x128xf32>
    %cst_49 = arith.constant 0.000000e+00 : f32
    %61 = vector.broadcast %cst_49 : f32 to vector<8x128xf32>
    %62 = arith.maximumf %60, %61 : vector<8x128xf32>
    %c8 = arith.constant 8 : index
    %c0_50 = arith.constant 0 : index
    %c0_51 = arith.constant 0 : index
    %63 = vector.load %arg2[%c8, %c0_50, %c0_51] : memref<10x128x128xf32, #tpu.memory_space<vmem>>, vector<1x128x128xf32>
    %64 = vector.shape_cast %63 : vector<1x128x128xf32> to vector<128x128xf32>
    %cst_52 = arith.constant dense<0.000000e+00> : vector<8x128xf32>
    %65 = tpu.matmul %62, %64, %cst_52 {dimension_numbers = #tpu.dot_dimension_numbers<[1], [0], [0], [1], [0, 0, 1, 1], [], []>} : vector<8x128xf32>, vector<128x128xf32>, vector<8x128xf32> -> vector<8x128xf32>
    %c8_53 = arith.constant 8 : index
    %c0_54 = arith.constant 0 : index
    %66 = vector.load %arg3[%c8_53, %c0_54] : memref<10x128xf32, #tpu.memory_space<vmem>>, vector<1x128xf32>
    %67 = vector.broadcast %66 : vector<1x128xf32> to vector<8x128xf32>
    %68 = arith.addf %65, %67 : vector<8x128xf32>
    %cst_55 = arith.constant 0.000000e+00 : f32
    %69 = vector.broadcast %cst_55 : f32 to vector<8x128xf32>
    %70 = arith.maximumf %68, %69 : vector<8x128xf32>
    %c9 = arith.constant 9 : index
    %c0_56 = arith.constant 0 : index
    %c0_57 = arith.constant 0 : index
    %71 = vector.load %arg2[%c9, %c0_56, %c0_57] : memref<10x128x128xf32, #tpu.memory_space<vmem>>, vector<1x128x128xf32>
    %72 = vector.shape_cast %71 : vector<1x128x128xf32> to vector<128x128xf32>
    %cst_58 = arith.constant dense<0.000000e+00> : vector<8x128xf32>
    %73 = tpu.matmul %70, %72, %cst_58 {dimension_numbers = #tpu.dot_dimension_numbers<[1], [0], [0], [1], [0, 0, 1, 1], [], []>} : vector<8x128xf32>, vector<128x128xf32>, vector<8x128xf32> -> vector<8x128xf32>
    %c9_59 = arith.constant 9 : index
    %c0_60 = arith.constant 0 : index
    %74 = vector.load %arg3[%c9_59, %c0_60] : memref<10x128xf32, #tpu.memory_space<vmem>>, vector<1x128xf32>
    %75 = vector.broadcast %74 : vector<1x128xf32> to vector<8x128xf32>
    %76 = arith.addf %73, %75 : vector<8x128xf32>
    %c0_61 = arith.constant 0 : index
    %c256 = arith.constant 256 : index
    %77 = vector.load %arg4[%c0_61, %c256] : memref<8x384xf32, #tpu.memory_space<vmem>>, vector<8x128xf32>
    tpu.vector_store %arg4[%c0_61, %c256], %76 {strides = array<i32>} : memref<8x384xf32, #tpu.memory_space<vmem>>, vector<8x128xf32>,
    return
  }
  func.func @transform_0(%arg0: i32) -> (i32, i32) {
    %c0_i32 = arith.constant 0 : i32
    %c0_i32_0 = arith.constant 0 : i32
    return %arg0, %c0_i32 : i32, i32
  }
  func.func @transform_1(%arg0: i32) -> (i32, i32, i32) {
    %c0_i32 = arith.constant 0 : i32
    %c0_i32_0 = arith.constant 0 : i32
    %c0_i32_1 = arith.constant 0 : i32
    %c0_i32_2 = arith.constant 0 : i32
    return %c0_i32, %c0_i32_0, %c0_i32_1 : i32, i32, i32
  }
  func.func @transform_2(%arg0: i32) -> (i32, i32) {
    %c0_i32 = arith.constant 0 : i32
    %c0_i32_0 = arith.constant 0 : i32
    %c0_i32_1 = arith.constant 0 : i32
    return %c0_i32, %c0_i32_0 : i32, i32
  }
  func.func @transform_3(%arg0: i32) -> (i32, i32) {
    %c0_i32 = arith.constant 0 : i32
    %c0_i32_0 = arith.constant 0 : i32
    return %arg0, %c0_i32 : i32, i32
  }
}

</mosaic_0001>

<bundles_post_ra>
// kernel: turl_forward.1
= control target key start
LH: loop header
LB: loop body
LE: loop exit
PB: predicated region body
PF: predicated region fallthrough
CT: control target
= control target key end

     0   :  { %8 = vsyncpa [#allocation3], 0  ;;  %s1763_s12 = smov [#allocation2]   ;;  %s1943_s0 = inlined_call_operand.vmem [shape: f32[8,128], index: 0, kind: input, shape index: {}]   ;;  %s1944_s1 = inlined_call_operand.hbm [shape: f32[10,128,128], index: 1, kind: input, shape index: {}]   ;;  %s1945_s2 = inlined_call_operand.vmem [shape: f32[10,128], index: 2, kind: input, shape index: {}]   ;;  %s1946_s3 = inlined_call_operand.vmem [shape: f32[8,384], index: 3, kind: output, shape index: {}]  }
   0x1   :  { %s16_s13 = sshll.u32 %s1763_s12, 4  ;;  %s1739_s16 = scalar_lea.hbm %s1944_s1, 20480  ;;  %s17_s13 = int_to_ptr.vmem [resolvable:$true] %s16_s13 }
   0x2   :  { %p1740_p0 = scmp.ne.s32.totalorder %s1944_s1, %s1739_s16  ;;  %p1743_p1 = scmp.lt.u32.totalorder %s1739_s16, %s1944_s1 }
   0x4   :  { %p1745_p2 = pnand %p1743_p1, %p1740_p0 }
   0x6   :  { %1748 = shalt.err (!%p1745_p2)
}
   0x7   :  { %s1749_s21 = scalar_lea.vmem %s17_s13, 20480  ;;  %p1754_p4 = scmp.lt.s32.totalorder %s17_s13, %s17_s13 }
   0x8   :  { %p1750_p3 = scmp.ne.s32.totalorder %s17_s13, %s1749_s21  ;;  %p1755_p5 = scmp.lt.s32.totalorder %s1749_s21, %s1749_s21 }
   0xa   :  { %p1756_p6 = por %p1755_p5, %p1754_p4 }
   0xc   :  { %p1757_p7 = pnand %p1756_p6, %p1750_p3 }
   0xe   :  { %1760 = shalt.err (!%p1757_p7)
}
   0xf   :  { %s1764_s22 = smov 128   ;;  %s1765_s23 = smov 8  }
  0x10   :  { %22 = dma.hbm_to_vmem [thread:$0]  %s1944_s1, 20480, %s17_s13, [#allocation3], %s1764_s22, %s1764_s22, %s1765_s23  }
  0x11   :  { %1761 = dma.done.wait [#allocation3], 20480  }
  0x12   :  { %1762 = vsyncadd [#allocation3], 4294946816  ;;  %v1766_v0 = vmov 0.0|0.0   ;;  %vm1767_vm0 = vmmov 0   ;;  %v1768_v1 = vmov 0.0   ;;  %v29_v2 = vld [vmem:[#allocation2] sm:$0xff] }
  0x13   :  { %1493 = vmatprep.subr.bf16.mxu0 %v1766_v0  ;;  %1175 = vmatprep.mubr.msk.f32.mxu0 %vm1767_vm0, %v1768_v1  ;;  %v30_v3 = vld [vmem:[#allocation2 + $0x8] sm:$0xff]  ;;  %v31_v4 = vld [vmem:[#allocation2 + $0x10] sm:$0xff]  ;;  %v32_v6 = vld [vmem:[#allocation2 + $0x18] sm:$0xff] }
  0x14   :  { %1517 = vmatprep.subr.bf16.mxu1 %v1766_v0  ;;  %1210 = vmatprep.mubr.msk.f32.mxu1 %vm1767_vm0, %v1768_v1  ;;  %v1494_v5 = vpack.c.bf16 %v30_v3, %v29_v2  ;;  %v1497_v7 = vpack.c.bf16 %v32_v6, %v31_v4  ;;  %v33_v8 = vld [vmem:[#allocation2 + $0x20] sm:$0xff]  ;;  %v34_v9 = vld [vmem:[#allocation2 + $0x28] sm:$0xff]  ;;  %v124_v12 = vld [vmem:[#allocation2 + $0x90] sm:$0xff] }
  0x15   :  { %v122_v10 = vld [vmem:[#allocation2 + $0x80] sm:$0xff]  ;;  %v123_v11 = vld [vmem:[#allocation2 + $0x88] sm:$0xff]  ;;  %v125_v13 = vld [vmem:[#allocation2 + $0x98] sm:$0xff]  ;;  %v1500_v14 = vpack.c.bf16 %v34_v9, %v33_v8 }
  0x16   :  { %1495 = vmatpush3.bf16.msra.mxu0 %v1494_v5  ;;  %v1518_v15 = vpack.c.bf16 %v123_v11, %v122_v10  ;;  %v35_v16 = vld [vmem:[#allocation2 + $0x30] sm:$0xff]  ;;  %v36_v17 = vld [vmem:[#allocation2 + $0x38] sm:$0xff]  ;;  %v1521_v18 = vpack.c.bf16 %v125_v13, %v124_v12  ;;  %v126_v19 = vld [vmem:[#allocation2 + $0xa0] sm:$0xff] }
  0x17   :  { %1496 = vmatprep.subr.bf16.mxu0 %v1766_v0  ;;  %v127_v20 = vld [vmem:[#allocation2 + $0xa8] sm:$0xff]  ;;  %v1503_v21 = vpack.c.bf16 %v36_v17, %v35_v16  ;;  %v37_v22 = vld [vmem:[#allocation2 + $0x40] sm:$0xff]  ;;  %v128_v25 = vld [vmem:[#allocation2 + $0xb0] sm:$0xff] }
  0x18   :  { %1519 = vmatpush3.bf16.msra.mxu1 %v1518_v15  ;;  %v38_v23 = vld [vmem:[#allocation2 + $0x48] sm:$0xff]  ;;  %v1524_v24 = vpack.c.bf16 %v127_v20, %v126_v19  ;;  %v129_v26 = vld [vmem:[#allocation2 + $0xb8] sm:$0xff]  ;;  %v39_v28 = vld [vmem:[#allocation2 + $0x50] sm:$0xff] }
  0x19   :  { %1520 = vmatprep.subr.bf16.mxu1 %v1766_v0  ;;  %v1506_v27 = vpack.c.bf16 %v38_v23, %v37_v22  ;;  %v40_v29 = vld [vmem:[#allocation2 + $0x58] sm:$0xff]  ;;  %v1527_v30 = vpack.c.bf16 %v129_v26, %v128_v25  ;;  %v130_v31 = vld [vmem:[#allocation2 + $0xc0] sm:$0xff]  ;;  %v131_v32 = vld [vmem:[#allocation2 + $0xc8] sm:$0xff] }
  0x1a   :  { %1498 = vmatpush3.bf16.msra.mxu0 %v1497_v7  ;;  %v1509_v33 = vpack.c.bf16 %v40_v29, %v39_v28  ;;  %v41_v34 = vld [vmem:[#allocation2 + $0x60] sm:$0xff]  ;;  %v42_v35 = vld [vmem:[#allocation2 + $0x68] sm:$0xff]  ;;  %v1530_v36 = vpack.c.bf16 %v131_v32, %v130_v31  ;;  %v132_v37 = vld [vmem:[#allocation2 + $0xd0] sm:$0xff] }
  0x1b   :  { %1499 = vmatprep.subr.bf16.mxu0 %v1766_v0  ;;  %v133_v38 = vld [vmem:[#allocation2 + $0xd8] sm:$0xff]  ;;  %v1512_v39 = vpack.c.bf16 %v42_v35, %v41_v34  ;;  %v43_v40 = vld [vmem:[#allocation2 + $0x70] sm:$0xff]  ;;  %v134_v43 = vld [vmem:[#allocation2 + $0xe0] sm:$0xff] }
  0x1c   :  { %1522 = vmatpush3.bf16.msra.mxu1 %v1521_v18  ;;  %v44_v41 = vld [vmem:[#allocation2 + $0x78] sm:$0xff]  ;;  %v1533_v42 = vpack.c.bf16 %v133_v38, %v132_v37  ;;  %v135_v44 = vld [vmem:[#allocation2 + $0xe8] sm:$0xff]  ;;  %v28_v47 = vld [vmem:[%s1943_s0] sm:$0xff] }
  0x1d   :  { %1523 = vmatprep.subr.bf16.mxu1 %v1766_v0  ;;  %v1515_v45 = vpack.c.bf16 %v44_v41, %v43_v40  ;;  %v1536_v46 = vpack.c.bf16 %v135_v44, %v134_v43  ;;  %v136_v48 = vld [vmem:[#allocation2 + $0xf0] sm:$0xff]  ;;  %v137_v49 = vld [vmem:[#allocation2 + $0xf8] sm:$0xff]  ;;  %v215_v51 = vld [vmem:[#allocation2 + $0x100] sm:$0xff] }
  0x1e   :  { %1501 = vmatpush3.bf16.msra.mxu0 %v1500_v14  ;;  %v1539_v50 = vpack.c.bf16 %v137_v49, %v136_v48  ;;  %v216_v52 = vld [vmem:[#allocation2 + $0x108] sm:$0xff]  ;;  %v217_v53 = vld [vmem:[#allocation2 + $0x110] sm:$0xff]  ;;  %v218_v55 = vld [vmem:[#allocation2 + $0x118] sm:$0xff] }
  0x1f   :  { %1502 = vmatprep.subr.bf16.mxu0 %v1766_v0  ;;  %v1542_v54 = vpack.c.bf16 %v216_v52, %v215_v51  ;;  %v1545_v56 = vpack.c.bf16 %v218_v55, %v217_v53  ;;  %v219_v57 = vld [vmem:[#allocation2 + $0x120] sm:$0xff]  ;;  %v220_v58 = vld [vmem:[#allocation2 + $0x128] sm:$0xff]  ;;  %v221_v60 = vld [vmem:[#allocation2 + $0x130] sm:$0xff] }
  0x20   :  { %1525 = vmatpush3.bf16.msra.mxu1 %v1524_v24  ;;  %v1548_v59 = vpack.c.bf16 %v220_v58, %v219_v57  ;;  %v222_v61 = vld [vmem:[#allocation2 + $0x138] sm:$0xff]  ;;  %v223_v63 = vld [vmem:[#allocation2 + $0x140] sm:$0xff]  ;;  %v224_v2 = vld [vmem:[#allocation2 + $0x148] sm:$0xff] }
  0x21   :  { %1526 = vmatprep.subr.bf16.mxu1 %v1766_v0  ;;  %v1551_v62 = vpack.c.bf16 %v222_v61, %v221_v60  ;;  %v1554_v3 = vpack.c.bf16 %v224_v2, %v223_v63  ;;  %v225_v4 = vld [vmem:[#allocation2 + $0x150] sm:$0xff]  ;;  %v226_v5 = vld [vmem:[#allocation2 + $0x158] sm:$0xff]  ;;  %v227_v7 = vld [vmem:[#allocation2 + $0x160] sm:$0xff] }
  0x22   :  { %1504 = vmatpush3.bf16.msra.mxu0 %v1503_v21  ;;  %v1557_v6 = vpack.c.bf16 %v226_v5, %v225_v4  ;;  %v228_v8 = vld [vmem:[#allocation2 + $0x168] sm:$0xff]  ;;  %v963_v10 = vld [vmem:[%s1945_s2] ss:$0 sm:$0xff]  ;;  %v230_v16 = vld [vmem:[#allocation2 + $0x178] sm:$0xff] }
  0x23   :  { %1505 = vmatprep.subr.bf16.mxu0 %v1766_v0  ;;  %v1560_v9 = vpack.c.bf16 %v228_v8, %v227_v7  ;;  %v229_v15 = vld [vmem:[#allocation2 + $0x170] sm:$0xff]  ;;  %v308_v18 = vld [vmem:[#allocation2 + $0x180] sm:$0xff]  ;;  %v309_v19 = vld [vmem:[#allocation2 + $0x188] sm:$0xff] }
  0x24   :  { %1528 = vmatpush3.bf16.msra.mxu1 %v1527_v30  ;;  %v1563_v17 = vpack.c.bf16 %v230_v16, %v229_v15  ;;  %v310_v20 = vld [vmem:[#allocation2 + $0x190] sm:$0xff]  ;;  %v1566_v21 = vpack.c.bf16 %v309_v19, %v308_v18  ;;  %v311_v22 = vld [vmem:[#allocation2 + $0x198] sm:$0xff]  ;;  %v312_v24 = vld [vmem:[#allocation2 + $0x1a0] sm:$0xff] }
  0x25   :  { %1529 = vmatprep.subr.bf16.mxu1 %v1766_v0  ;;  %v1569_v23 = vpack.c.bf16 %v311_v22, %v310_v20  ;;  %v313_v25 = vld [vmem:[#allocation2 + $0x1a8] sm:$0xff]  ;;  %v315_v28 = vld [vmem:[#allocation2 + $0x1b8] sm:$0xff]  ;;  %v316_v30 = vld [vmem:[#allocation2 + $0x1c0] sm:$0xff] }
  0x26   :  { %1507 = vmatpush3.bf16.msra.mxu0 %v1506_v27  ;;  %v1572_v26 = vpack.c.bf16 %v313_v25, %v312_v24  ;;  %v314_v27 = vld [vmem:[#allocation2 + $0x1b0] sm:$0xff]  ;;  %v317_v31 = vld [vmem:[#allocation2 + $0x1c8] sm:$0xff]  ;;  %v319_v34 = vld [vmem:[#allocation2 + $0x1d8] sm:$0xff] }
  0x27   :  { %1508 = vmatprep.subr.bf16.mxu0 %v1766_v0  ;;  %v1575_v29 = vpack.c.bf16 %v315_v28, %v314_v27  ;;  %v1578_v32 = vpack.c.bf16 %v317_v31, %v316_v30  ;;  %v321_v37 = vld [vmem:[#allocation2 + $0x1e8] sm:$0xff]  ;;  %v322_v44 = vld [vmem:[#allocation2 + $0x1f0] sm:$0xff]  ;;  %v404_v51 = vld [vmem:[#allocation2 + $0x218] sm:$0xff] }
  0x28   :  { %1531 = vmatpush3.bf16.msra.mxu1 %v1530_v36  ;;  %v320_v36 = vld [vmem:[#allocation2 + $0x1e0] sm:$0xff]  ;;  %v402_v48 = vld [vmem:[#allocation2 + $0x208] sm:$0xff]  ;;  %v403_v49 = vld [vmem:[#allocation2 + $0x210] sm:$0xff] }
  0x29   :  { %1532 = vmatprep.subr.bf16.mxu1 %v1766_v0  ;;  %v1584_v38 = vpack.c.bf16 %v321_v37, %v320_v36  ;;  %v1593_v52 = vpack.c.bf16 %v404_v51, %v403_v49  ;;  %v405_v53 = vld [vmem:[#allocation2 + $0x220] sm:$0xff]  ;;  %v408_v57 = vld [vmem:[#allocation2 + $0x238] sm:$0xff]  ;;  %v410_v60 = vld [vmem:[#allocation2 + $0x248] sm:$0xff] }
  0x2a   :  { %1510 = vmatpush3.bf16.msra.mxu0 %v1509_v33  ;;  %v318_v33 = vld [vmem:[#allocation2 + $0x1d0] sm:$0xff]  ;;  %v412_v63 = vld [vmem:[#allocation2 + $0x258] sm:$0xff]  ;;  %v414_v4 = vld [vmem:[#allocation2 + $0x268] sm:$0xff] }
  0x2b   :  { %1511 = vmatprep.subr.bf16.mxu0 %v1766_v0  ;;  %v1581_v35 = vpack.c.bf16 %v319_v34, %v318_v33  ;;  %v495_v15 = vld [vmem:[#allocation2 + $0x288] sm:$0xff]  ;;  %v496_v16 = vld [vmem:[#allocation2 + $0x290] sm:$0xff]  ;;  %v497_v18 = vld [vmem:[#allocation2 + $0x298] sm:$0xff] }
  0x2c   :  { %1534 = vmatpush3.bf16.msra.mxu1 %v1533_v42  ;;  %v1617_v19 = vpack.c.bf16 %v497_v18, %v496_v16  ;;  %v498_v20 = vld [vmem:[#allocation2 + $0x2a0] sm:$0xff]  ;;  %v501_v24 = vld [vmem:[#allocation2 + $0x2b8] sm:$0xff]  ;;  %v503_v27 = vld [vmem:[#allocation2 + $0x2c8] sm:$0xff] }
  0x2d   :  { %1535 = vmatprep.subr.bf16.mxu1 %v1766_v0  ;;  %v505_v30 = vld [vmem:[#allocation2 + $0x2d8] sm:$0xff]  ;;  %v507_v33 = vld [vmem:[#allocation2 + $0x2e8] sm:$0xff]  ;;  %v593_v51 = vld [vmem:[#allocation2 + $0x330] sm:$0xff] }
  0x2e   :  { %1513 = vmatpush3.bf16.msra.mxu0 %v1512_v39  ;;  %v964_v39 = vld [vmem:[%s1945_s2 + $0x1] ss:$0 sm:$0xff]  ;;  %v592_v49 = vld [vmem:[#allocation2 + $0x328] sm:$0xff] }
  0x2f   :  { %1514 = vmatprep.subr.bf16.mxu0 %v1766_v0  ;;  %v685_v16 = vld [vmem:[#allocation2 + $0x3a8] sm:$0xff]  ;;  %v686_v18 = vld [vmem:[#allocation2 + $0x3b0] sm:$0xff] }
  0x30   :  { %1537 = vmatpush3.bf16.msra.mxu1 %v1536_v46 }
  0x31   :  { %1538 = vmatprep.subr.bf16.mxu1 %v1766_v0 }
  0x32   :  { %1516 = vmatpush3.bf16.msra.mxu0 %v1515_v45  ;;  %v323_v45 = vld [vmem:[#allocation2 + $0x1f8] sm:$0xff] }
  0x33   :  { %1541 = vmatprep.subr.bf16.mxu0 %v1766_v0  ;;  %v1587_v46 = vpack.c.bf16 %v323_v45, %v322_v44  ;;  %v589_v44 = vld [vmem:[#allocation2 + $0x310] sm:$0xff] }
  0x34   :  { %1540 = vmatpush3.bf16.msra.mxu1 %v1539_v50 }
  0x35   :  { %1176 = vmatmul.mubr.f32.vlgmr.msra.gmra.mrb[0].mxu0 %v28_v47  ;;  %1565 = vmatprep.subr.bf16.mxu1 %v1766_v0  ;;  %v401_v47 = vld [vmem:[#allocation2 + $0x200] sm:$0xff] }
  0x36   :  { %1245 = vmatprep.mubr.msk.f32.mxu0 %vm1767_vm0, %v1768_v1  ;;  %1543 = vmatpush3.bf16.msra.mxu0 %v1542_v54  ;;  %v1590_v50 = vpack.c.bf16 %v402_v48, %v401_v47  ;;  %v406_v54 = vld [vmem:[#allocation2 + $0x228] sm:$0xff]  ;;  %v591_v48 = vld [vmem:[#allocation2 + $0x320] sm:$0xff] }
  0x37   :  { %1544 = vmatprep.subr.bf16.mxu0 %v1766_v0  ;;  %v1596_v55 = vpack.c.bf16 %v406_v54, %v405_v53  ;;  %v595_v54 = vld [vmem:[#allocation2 + $0x340] sm:$0xff] }
  0x3a   :  { %1546 = vmatpush3.bf16.msra.mxu0 %v1545_v56  ;;  %v407_v56 = vld [vmem:[#allocation2 + $0x230] sm:$0xff] }
  0x3b   :  { %1547 = vmatprep.subr.bf16.mxu0 %v1766_v0  ;;  %v1599_v58 = vpack.c.bf16 %v408_v57, %v407_v56  ;;  %v597_v57 = vld [vmem:[#allocation2 + $0x350] sm:$0xff] }
  0x3e   :  { %1549 = vmatpush3.bf16.msra.mxu0 %v1548_v59  ;;  %v409_v59 = vld [vmem:[#allocation2 + $0x240] sm:$0xff] }
  0x3f   :  { %1550 = vmatprep.subr.bf16.mxu0 %v1766_v0  ;;  %v1602_v61 = vpack.c.bf16 %v410_v60, %v409_v59  ;;  %v599_v60 = vld [vmem:[#allocation2 + $0x360] sm:$0xff] }
  0x42   :  { %1552 = vmatpush3.bf16.msra.mxu0 %v1551_v62  ;;  %v411_v62 = vld [vmem:[#allocation2 + $0x250] sm:$0xff] }
  0x43   :  { %1553 = vmatprep.subr.bf16.mxu0 %v1766_v0  ;;  %v1605_v2 = vpack.c.bf16 %v412_v63, %v411_v62  ;;  %v967_v63 = vld [vmem:[%s1945_s2 + $0x4] ss:$0 sm:$0xff] }
  0x46   :  { %1555 = vmatpush3.bf16.msra.mxu0 %v1554_v3  ;;  %v413_v3 = vld [vmem:[#allocation2 + $0x260] sm:$0xff] }
  0x47   :  { %1556 = vmatprep.subr.bf16.mxu0 %v1766_v0  ;;  %v1608_v5 = vpack.c.bf16 %v414_v4, %v413_v3 }
  0x4a   :  { %1558 = vmatpush3.bf16.msra.mxu0 %v1557_v6  ;;  %v965_v6 = vld [vmem:[%s1945_s2 + $0x2] ss:$0 sm:$0xff] }
  0x4b   :  { %1559 = vmatprep.subr.bf16.mxu0 %v1766_v0 }
  0x4e   :  { %1561 = vmatpush3.bf16.msra.mxu0 %v1560_v9 }
  0x4f   :  { %1562 = vmatprep.subr.bf16.mxu0 %v1766_v0 }
  0x52   :  { %1564 = vmatpush3.bf16.msra.mxu0 %v1563_v17 }
  0x53   :  { %1589 = vmatprep.subr.bf16.mxu0 %v1766_v0 }
 0x108   :  { %v116_v11 = vpop.f32.mrb[0].mxu0 }
 0x109   :  { %v117_v12 = vadd.f32 %v963_v10, %v116_v11  ;;  %v1177_v13 = vpop.f32.mrb[1].mxu0  ;;  %v415_v11 = vld [vmem:[#allocation2 + $0x270] sm:$0xff] }
 0x10b   :  { %v120_v14 = vmax.f32 %v117_v12, 0.0  ;;  %v416_v12 = vld [vmem:[#allocation2 + $0x278] sm:$0xff] }
 0x10c   :  { %v1611_v13 = vpack.c.bf16 %v416_v12, %v415_v11  ;;  %v682_v11 = vld [vmem:[#allocation2 + $0x390] sm:$0xff] }
 0x10d   :  { %1211 = vmatmul.mubr.f32.vlgmr.msra.gmra.mrb[0].mxu1 %v120_v14  ;;  %v494_v14 = vld [vmem:[#allocation2 + $0x280] sm:$0xff] }
 0x10e   :  { %1280 = vmatprep.mubr.msk.f32.mxu1 %vm1767_vm0, %v1768_v1  ;;  %1567 = vmatpush3.bf16.msra.mxu1 %v1566_v21  ;;  %v1614_v17 = vpack.c.bf16 %v495_v15, %v494_v14  ;;  %v499_v21 = vld [vmem:[#allocation2 + $0x2a8] sm:$0xff]  ;;  %v684_v15 = vld [vmem:[#allocation2 + $0x3a0] sm:$0xff] }
 0x10f   :  { %1568 = vmatprep.subr.bf16.mxu1 %v1766_v0  ;;  %v1620_v22 = vpack.c.bf16 %v499_v21, %v498_v20  ;;  %v688_v21 = vld [vmem:[#allocation2 + $0x3c0] sm:$0xff] }
 0x112   :  { %1570 = vmatpush3.bf16.msra.mxu1 %v1569_v23  ;;  %v500_v23 = vld [vmem:[#allocation2 + $0x2b0] sm:$0xff] }
 0x113   :  { %1571 = vmatprep.subr.bf16.mxu1 %v1766_v0  ;;  %v1623_v25 = vpack.c.bf16 %v501_v24, %v500_v23  ;;  %v690_v24 = vld [vmem:[#allocation2 + $0x3d0] sm:$0xff] }
 0x116   :  { %1573 = vmatpush3.bf16.msra.mxu1 %v1572_v26  ;;  %v502_v26 = vld [vmem:[#allocation2 + $0x2c0] sm:$0xff] }
 0x117   :  { %1574 = vmatprep.subr.bf16.mxu1 %v1766_v0  ;;  %v1626_v28 = vpack.c.bf16 %v503_v27, %v502_v26  ;;  %v692_v27 = vld [vmem:[#allocation2 + $0x3e0] sm:$0xff] }
 0x11a   :  { %1576 = vmatpush3.bf16.msra.mxu1 %v1575_v29  ;;  %v504_v29 = vld [vmem:[#allocation2 + $0x2d0] sm:$0xff] }
 0x11b   :  { %1577 = vmatprep.subr.bf16.mxu1 %v1766_v0  ;;  %v1629_v31 = vpack.c.bf16 %v505_v30, %v504_v29  ;;  %v968_v30 = vld [vmem:[%s1945_s2 + $0x5] ss:$0 sm:$0xff] }
 0x11e   :  { %1579 = vmatpush3.bf16.msra.mxu1 %v1578_v32  ;;  %v506_v32 = vld [vmem:[#allocation2 + $0x2e0] sm:$0xff] }
 0x11f   :  { %1580 = vmatprep.subr.bf16.mxu1 %v1766_v0  ;;  %v1632_v34 = vpack.c.bf16 %v507_v33, %v506_v32 }
 0x122   :  { %1582 = vmatpush3.bf16.msra.mxu1 %v1581_v35  ;;  %v966_v35 = vld [vmem:[%s1945_s2 + $0x3] ss:$0 sm:$0xff] }
 0x123   :  { %1583 = vmatprep.subr.bf16.mxu1 %v1766_v0 }
 0x126   :  { %1585 = vmatpush3.bf16.msra.mxu1 %v1584_v38 }
 0x127   :  { %1586 = vmatprep.subr.bf16.mxu1 %v1766_v0 }
 0x12a   :  { %1588 = vmatpush3.bf16.msra.mxu1 %v1587_v46  ;;  %v590_v46 = vld [vmem:[#allocation2 + $0x318] sm:$0xff] }
 0x12b   :  { %1613 = vmatprep.subr.bf16.mxu1 %v1766_v0  ;;  %v1641_v47 = vpack.c.bf16 %v590_v46, %v589_v44  ;;  %v777_v44 = vld [vmem:[#allocation2 + $0x420] sm:$0xff] }
 0x1e0   :  { %v209_v40 = vpop.f32.mrb[0].mxu1 }
 0x1e1   :  { %v210_v41 = vadd.f32 %v964_v39, %v209_v40  ;;  %v1212_v42 = vpop.f32.mrb[1].mxu1  ;;  %v508_v39 = vld [vmem:[#allocation2 + $0x2f0] sm:$0xff]  ;;  %v509_v40 = vld [vmem:[#allocation2 + $0x2f8] sm:$0xff] }
 0x1e2   :  { %v587_v42 = vld [vmem:[#allocation2 + $0x300] sm:$0xff] }
 0x1e3   :  { %v213_v43 = vmax.f32 %v210_v41, 0.0  ;;  %v1635_v41 = vpack.c.bf16 %v509_v40, %v508_v39  ;;  %v774_v39 = vld [vmem:[#allocation2 + $0x408] sm:$0xff]  ;;  %v775_v40 = vld [vmem:[#allocation2 + $0x410] sm:$0xff] }
 0x1e5   :  { %1246 = vmatmul.mubr.f32.vlgmr.msra.gmra.mrb[2].mxu0 %v213_v43  ;;  %v588_v43 = vld [vmem:[#allocation2 + $0x308] sm:$0xff] }
 0x1e6   :  { %1315 = vmatprep.mubr.msk.f32.mxu0 %vm1767_vm0, %v1768_v1  ;;  %1591 = vmatpush3.bf16.msra.mxu0 %v1590_v50  ;;  %v1638_v45 = vpack.c.bf16 %v588_v43, %v587_v42  ;;  %v1644_v50 = vpack.c.bf16 %v592_v49, %v591_v48  ;;  %v776_v42 = vld [vmem:[#allocation2 + $0x418] sm:$0xff] }
 0x1e7   :  { %1592 = vmatprep.subr.bf16.mxu0 %v1766_v0  ;;  %v1689_v43 = vpack.c.bf16 %v776_v42, %v775_v40  ;;  %v780_v48 = vld [vmem:[#allocation2 + $0x438] sm:$0xff] }
 0x1ea   :  { %1594 = vmatpush3.bf16.msra.mxu0 %v1593_v52  ;;  %v594_v52 = vld [vmem:[#allocation2 + $0x338] sm:$0xff] }
 0x1eb   :  { %1595 = vmatprep.subr.bf16.mxu0 %v1766_v0  ;;  %v1647_v53 = vpack.c.bf16 %v594_v52, %v593_v51  ;;  %v782_v51 = vld [vmem:[#allocation2 + $0x448] sm:$0xff] }
 0x1ee   :  { %1597 = vmatpush3.bf16.msra.mxu0 %v1596_v55  ;;  %v596_v55 = vld [vmem:[#allocation2 + $0x348] sm:$0xff] }
 0x1ef   :  { %1598 = vmatprep.subr.bf16.mxu0 %v1766_v0  ;;  %v1650_v56 = vpack.c.bf16 %v596_v55, %v595_v54  ;;  %v784_v54 = vld [vmem:[#allocation2 + $0x458] sm:$0xff] }
 0x1f2   :  { %1600 = vmatpush3.bf16.msra.mxu0 %v1599_v58  ;;  %v598_v58 = vld [vmem:[#allocation2 + $0x358] sm:$0xff] }
 0x1f3   :  { %1601 = vmatprep.subr.bf16.mxu0 %v1766_v0  ;;  %v1653_v59 = vpack.c.bf16 %v598_v58, %v597_v57  ;;  %v786_v57 = vld [vmem:[#allocation2 + $0x468] sm:$0xff] }
 0x1f6   :  { %1603 = vmatpush3.bf16.msra.mxu0 %v1602_v61  ;;  %v600_v61 = vld [vmem:[#allocation2 + $0x368] sm:$0xff] }
 0x1f7   :  { %1604 = vmatprep.subr.bf16.mxu0 %v1766_v0  ;;  %v1656_v62 = vpack.c.bf16 %v600_v61, %v599_v60 }
 0x1fa   :  { %1606 = vmatpush3.bf16.msra.mxu0 %v1605_v2 }
 0x1fb   :  { %1607 = vmatprep.subr.bf16.mxu0 %v1766_v0 }
 0x1fe   :  { %1609 = vmatpush3.bf16.msra.mxu0 %v1608_v5 }
 0x1ff   :  { %1610 = vmatprep.subr.bf16.mxu0 %v1766_v0 }
 0x202   :  { %1612 = vmatpush3.bf16.msra.mxu0 %v1611_v13  ;;  %v683_v13 = vld [vmem:[#allocation2 + $0x398] sm:$0xff] }
 0x203   :  { %1637 = vmatprep.subr.bf16.mxu0 %v1766_v0  ;;  %v1665_v14 = vpack.c.bf16 %v683_v13, %v682_v11  ;;  %v871_v11 = vld [vmem:[#allocation2 + $0x4a8] sm:$0xff]  ;;  %v873_v13 = vld [vmem:[#allocation2 + $0x4b8] sm:$0xff] }
 0x2b8   :  { %v302_v7 = vpop.f32.mrb[2].mxu0 }
 0x2b9   :  { %v303_v8 = vadd.f32 %v965_v6, %v302_v7  ;;  %v1247_v9 = vpop.f32.mrb[3].mxu0  ;;  %v601_v6 = vld [vmem:[#allocation2 + $0x370] sm:$0xff]  ;;  %v602_v7 = vld [vmem:[#allocation2 + $0x378] sm:$0xff] }
 0x2ba   :  { %v680_v9 = vld [vmem:[#allocation2 + $0x380] sm:$0xff] }
 0x2bb   :  { %v306_v10 = vmax.f32 %v303_v8, 0.0  ;;  %v1659_v8 = vpack.c.bf16 %v602_v7, %v601_v6  ;;  %v868_v6 = vld [vmem:[#allocation2 + $0x490] sm:$0xff] }
 0x2bd   :  { %1281 = vmatmul.mubr.f32.vlgmr.msra.gmra.mrb[2].mxu1 %v306_v10  ;;  %v681_v10 = vld [vmem:[#allocation2 + $0x388] sm:$0xff] }
 0x2be   :  { %1350 = vmatprep.mubr.msk.f32.mxu1 %vm1767_vm0, %v1768_v1  ;;  %1615 = vmatpush3.bf16.msra.mxu1 %v1614_v17  ;;  %v1662_v12 = vpack.c.bf16 %v681_v10, %v680_v9  ;;  %v1668_v17 = vpack.c.bf16 %v685_v16, %v684_v15  ;;  %v870_v10 = vld [vmem:[#allocation2 + $0x4a0] sm:$0xff]  ;;  %v875_v16 = vld [vmem:[#allocation2 + $0x4c8] sm:$0xff] }
 0x2bf   :  { %1616 = vmatprep.subr.bf16.mxu1 %v1766_v0  ;;  %v874_v15 = vld [vmem:[#allocation2 + $0x4c0] sm:$0xff] }
 0x2c2   :  { %1618 = vmatpush3.bf16.msra.mxu1 %v1617_v19  ;;  %v687_v19 = vld [vmem:[#allocation2 + $0x3b8] sm:$0xff] }
 0x2c3   :  { %1619 = vmatprep.subr.bf16.mxu1 %v1766_v0  ;;  %v1671_v20 = vpack.c.bf16 %v687_v19, %v686_v18  ;;  %v876_v18 = vld [vmem:[#allocation2 + $0x4d0] sm:$0xff]  ;;  %v877_v19 = vld [vmem:[#allocation2 + $0x4d8] sm:$0xff] }
 0x2c6   :  { %1621 = vmatpush3.bf16.msra.mxu1 %v1620_v22  ;;  %v689_v22 = vld [vmem:[#allocation2 + $0x3c8] sm:$0xff] }
 0x2c7   :  { %1622 = vmatprep.subr.bf16.mxu1 %v1766_v0  ;;  %v1674_v23 = vpack.c.bf16 %v689_v22, %v688_v21  ;;  %v878_v21 = vld [vmem:[#allocation2 + $0x4e0] sm:$0xff]  ;;  %v879_v22 = vld [vmem:[#allocation2 + $0x4e8] sm:$0xff] }
 0x2ca   :  { %1624 = vmatpush3.bf16.msra.mxu1 %v1623_v25  ;;  %v691_v25 = vld [vmem:[#allocation2 + $0x3d8] sm:$0xff] }
 0x2cb   :  { %1625 = vmatprep.subr.bf16.mxu1 %v1766_v0  ;;  %v1677_v26 = vpack.c.bf16 %v691_v25, %v690_v24  ;;  %v970_v24 = vld [vmem:[%s1945_s2 + $0x7] ss:$0 sm:$0xff] }
 0x2ce   :  { %1627 = vmatpush3.bf16.msra.mxu1 %v1626_v28  ;;  %v693_v28 = vld [vmem:[#allocation2 + $0x3e8] sm:$0xff] }
 0x2cf   :  { %1628 = vmatprep.subr.bf16.mxu1 %v1766_v0  ;;  %v1680_v29 = vpack.c.bf16 %v693_v28, %v692_v27 }
 0x2d2   :  { %1630 = vmatpush3.bf16.msra.mxu1 %v1629_v31 }
 0x2d3   :  { %1631 = vmatprep.subr.bf16.mxu1 %v1766_v0 }
 0x2d6   :  { %1633 = vmatpush3.bf16.msra.mxu1 %v1632_v34 }
 0x2d7   :  { %1634 = vmatprep.subr.bf16.mxu1 %v1766_v0 }
 0x2da   :  { %1636 = vmatpush3.bf16.msra.mxu1 %v1635_v41 }
 0x2db   :  { %1661 = vmatprep.subr.bf16.mxu1 %v1766_v0 }
 0x390   :  { %v395_v36 = vpop.f32.mrb[2].mxu1 }
 0x391   :  { %v396_v37 = vadd.f32 %v966_v35, %v395_v36  ;;  %v1282_v38 = vpop.f32.mrb[3].mxu1  ;;  %v694_v35 = vld [vmem:[#allocation2 + $0x3f0] sm:$0xff]  ;;  %v695_v36 = vld [vmem:[#allocation2 + $0x3f8] sm:$0xff] }
 0x392   :  { %v773_v38 = vld [vmem:[#allocation2 + $0x400] sm:$0xff] }
 0x393   :  { %399 = vst [vmem:[%s1946_s3] sm:$0xff] %v396_v37  ;;  %1316 = vmatmul.mubr.f32.vlgmr.msra.gmra.mrb[4].mxu0 %v396_v37  ;;  %v1683_v37 = vpack.c.bf16 %v695_v36, %v694_v35  ;;  %v1686_v41 = vpack.c.bf16 %v774_v39, %v773_v38  ;;  %v972_v36 = vld [vmem:[%s1945_s2 + $0x9] ss:$0 sm:$0xff] }
 0x394   :  { %1385 = vmatprep.mubr.msk.f32.mxu0 %vm1767_vm0, %v1768_v1  ;;  %1639 = vmatpush3.bf16.msra.mxu0 %v1638_v45  ;;  %v778_v45 = vld [vmem:[#allocation2 + $0x428] sm:$0xff] }
 0x395   :  { %1640 = vmatprep.subr.bf16.mxu0 %v1766_v0  ;;  %v1692_v46 = vpack.c.bf16 %v778_v45, %v777_v44 }
 0x398   :  { %1642 = vmatpush3.bf16.msra.mxu0 %v1641_v47  ;;  %v779_v47 = vld [vmem:[#allocation2 + $0x430] sm:$0xff] }
 0x399   :  { %1643 = vmatprep.subr.bf16.mxu0 %v1766_v0  ;;  %v1695_v49 = vpack.c.bf16 %v780_v48, %v779_v47 }
 0x39c   :  { %1645 = vmatpush3.bf16.msra.mxu0 %v1644_v50  ;;  %v781_v50 = vld [vmem:[#allocation2 + $0x440] sm:$0xff] }
 0x39d   :  { %1646 = vmatprep.subr.bf16.mxu0 %v1766_v0  ;;  %v1698_v52 = vpack.c.bf16 %v782_v51, %v781_v50 }
 0x3a0   :  { %1648 = vmatpush3.bf16.msra.mxu0 %v1647_v53  ;;  %v783_v53 = vld [vmem:[#allocation2 + $0x450] sm:$0xff] }
 0x3a1   :  { %1649 = vmatprep.subr.bf16.mxu0 %v1766_v0  ;;  %v1701_v55 = vpack.c.bf16 %v784_v54, %v783_v53 }
 0x3a4   :  { %1651 = vmatpush3.bf16.msra.mxu0 %v1650_v56  ;;  %v785_v56 = vld [vmem:[#allocation2 + $0x460] sm:$0xff] }
 0x3a5   :  { %1652 = vmatprep.subr.bf16.mxu0 %v1766_v0  ;;  %v1704_v58 = vpack.c.bf16 %v786_v57, %v785_v56 }
 0x3a8   :  { %1654 = vmatpush3.bf16.msra.mxu0 %v1653_v59  ;;  %v969_v59 = vld [vmem:[%s1945_s2 + $0x6] ss:$0 sm:$0xff] }
 0x3a9   :  { %1655 = vmatprep.subr.bf16.mxu0 %v1766_v0 }
 0x3ac   :  { %1657 = vmatpush3.bf16.msra.mxu0 %v1656_v62 }
 0x3ad   :  { %1658 = vmatprep.subr.bf16.mxu0 %v1766_v0 }
 0x3b0   :  { %1660 = vmatpush3.bf16.msra.mxu0 %v1659_v8  ;;  %v869_v8 = vld [vmem:[#allocation2 + $0x498] sm:$0xff] }
 0x3b1   :  { %1685 = vmatprep.subr.bf16.mxu0 %v1766_v0  ;;  %v1713_v9 = vpack.c.bf16 %v869_v8, %v868_v6 }
 0x466   :  { %v488_v2 = vpop.f32.mrb[4].mxu0 }
 0x467   :  { %v489_v3 = vadd.f32 %v967_v63, %v488_v2  ;;  %v1317_v4 = vpop.f32.mrb[5].mxu0  ;;  %v787_v63 = vld [vmem:[#allocation2 + $0x470] sm:$0xff]  ;;  %v788_v2 = vld [vmem:[#allocation2 + $0x478] sm:$0xff] }
 0x468   :  { %v866_v4 = vld [vmem:[#allocation2 + $0x480] sm:$0xff] }
 0x469   :  { %v492_v5 = vmax.f32 %v489_v3, 0.0  ;;  %v1707_v3 = vpack.c.bf16 %v788_v2, %v787_v63 }
 0x46b   :  { %1351 = vmatmul.mubr.f32.vlgmr.msra.gmra.mrb[4].mxu1 %v492_v5  ;;  %v867_v5 = vld [vmem:[#allocation2 + $0x488] sm:$0xff] }
 0x46c   :  { %1420 = vmatprep.mubr.msk.f32.mxu1 %vm1767_vm0, %v1768_v1  ;;  %1663 = vmatpush3.bf16.msra.mxu1 %v1662_v12  ;;  %v1710_v7 = vpack.c.bf16 %v867_v5, %v866_v4  ;;  %v1716_v12 = vpack.c.bf16 %v871_v11, %v870_v10 }
 0x46d   :  { %1664 = vmatprep.subr.bf16.mxu1 %v1766_v0 }
 0x470   :  { %1666 = vmatpush3.bf16.msra.mxu1 %v1665_v14 }
 0x471   :  { %1667 = vmatprep.subr.bf16.mxu1 %v1766_v0 }
 0x474   :  { %1669 = vmatpush3.bf16.msra.mxu1 %v1668_v17  ;;  %v1722_v17 = vpack.c.bf16 %v875_v16, %v874_v15 }
 0x475   :  { %1670 = vmatprep.subr.bf16.mxu1 %v1766_v0 }
 0x478   :  { %1672 = vmatpush3.bf16.msra.mxu1 %v1671_v20  ;;  %v1725_v20 = vpack.c.bf16 %v877_v19, %v876_v18 }
 0x479   :  { %1673 = vmatprep.subr.bf16.mxu1 %v1766_v0 }
 0x47c   :  { %1675 = vmatpush3.bf16.msra.mxu1 %v1674_v23  ;;  %v1728_v23 = vpack.c.bf16 %v879_v22, %v878_v21 }
 0x47d   :  { %1676 = vmatprep.subr.bf16.mxu1 %v1766_v0 }
 0x480   :  { %1678 = vmatpush3.bf16.msra.mxu1 %v1677_v26 }
 0x481   :  { %1679 = vmatprep.subr.bf16.mxu1 %v1766_v0 }
 0x484   :  { %1681 = vmatpush3.bf16.msra.mxu1 %v1680_v29  ;;  %v880_v29 = vld [vmem:[#allocation2 + $0x4f0] sm:$0xff] }
 0x485   :  { %1682 = vmatprep.subr.bf16.mxu1 %v1766_v0 }
 0x488   :  { %1684 = vmatpush3.bf16.msra.mxu1 %v1683_v37 }
 0x489   :  { %1709 = vmatprep.subr.bf16.mxu1 %v1766_v0 }
 0x53e   :  { %v581_v31 = vpop.f32.mrb[4].mxu1 }
 0x53f   :  { %v582_v32 = vadd.f32 %v968_v30, %v581_v31  ;;  %v1352_v33 = vpop.f32.mrb[5].mxu1  ;;  %v881_v30 = vld [vmem:[#allocation2 + $0x4f8] sm:$0xff] }
 0x540   :  { %v1731_v31 = vpack.c.bf16 %v881_v30, %v880_v29 }
 0x541   :  { %v585_v34 = vmax.f32 %v582_v32, 0.0  ;;  %v971_v32 = vld [vmem:[%s1945_s2 + $0x8] ss:$0 sm:$0xff] }
 0x543   :  { %1386 = vmatmul.mubr.f32.vlgmr.msra.gmra.mrb[6].mxu0 %v585_v34 }
 0x544   :  { %1455 = vmatprep.mubr.msk.f32.mxu0 %vm1767_vm0, %v1768_v1  ;;  %1687 = vmatpush3.bf16.msra.mxu0 %v1686_v41 }
 0x545   :  { %1688 = vmatprep.subr.bf16.mxu0 %v1766_v0 }
 0x548   :  { %1690 = vmatpush3.bf16.msra.mxu0 %v1689_v43 }
 0x549   :  { %1691 = vmatprep.subr.bf16.mxu0 %v1766_v0 }
 0x54c   :  { %1693 = vmatpush3.bf16.msra.mxu0 %v1692_v46 }
 0x54d   :  { %1694 = vmatprep.subr.bf16.mxu0 %v1766_v0 }
 0x550   :  { %1696 = vmatpush3.bf16.msra.mxu0 %v1695_v49 }
 0x551   :  { %1697 = vmatprep.subr.bf16.mxu0 %v1766_v0 }
 0x554   :  { %1699 = vmatpush3.bf16.msra.mxu0 %v1698_v52 }
 0x555   :  { %1700 = vmatprep.subr.bf16.mxu0 %v1766_v0 }
 0x558   :  { %1702 = vmatpush3.bf16.msra.mxu0 %v1701_v55 }
 0x559   :  { %1703 = vmatprep.subr.bf16.mxu0 %v1766_v0 }
 0x55c   :  { %1705 = vmatpush3.bf16.msra.mxu0 %v1704_v58 }
 0x55d   :  { %1706 = vmatprep.subr.bf16.mxu0 %v1766_v0 }
 0x560   :  { %1708 = vmatpush3.bf16.msra.mxu0 %v1707_v3 }
 0x616   :  { %v674_v60 = vpop.f32.mrb[6].mxu0 }
 0x617   :  { %v675_v61 = vadd.f32 %v969_v59, %v674_v60  ;;  %v1387_v62 = vpop.f32.mrb[7].mxu0 }
 0x619   :  { %678 = vst [vmem:[%s1946_s3 + $0x8] sm:$0xff] %v675_v61  ;;  %1421 = vmatmul.mubr.f32.vlgmr.msra.gmra.mrb[6].mxu1 %v675_v61 }
 0x61a   :  { %1490 = vmatprep.mubr.msk.f32.mxu1 %vm1767_vm0, %v1768_v1  ;;  %1711 = vmatpush3.bf16.msra.mxu1 %v1710_v7  ;;  %v872_v1 = vld [vmem:[#allocation2 + $0x4b0] sm:$0xff] }
 0x61b   :  { %1712 = vmatprep.subr.bf16.mxu1 %v1766_v0  ;;  %v1719_v14 = vpack.c.bf16 %v873_v13, %v872_v1 }
 0x61e   :  { %1714 = vmatpush3.bf16.msra.mxu1 %v1713_v9 }
 0x61f   :  { %1715 = vmatprep.subr.bf16.mxu1 %v1766_v0 }
 0x622   :  { %1717 = vmatpush3.bf16.msra.mxu1 %v1716_v12 }
 0x623   :  { %1718 = vmatprep.subr.bf16.mxu1 %v1766_v0 }
 0x626   :  { %1720 = vmatpush3.bf16.msra.mxu1 %v1719_v14 }
 0x627   :  { %1721 = vmatprep.subr.bf16.mxu1 %v1766_v0 }
 0x62a   :  { %1723 = vmatpush3.bf16.msra.mxu1 %v1722_v17 }
 0x62b   :  { %1724 = vmatprep.subr.bf16.mxu1 %v1766_v0 }
 0x62e   :  { %1726 = vmatpush3.bf16.msra.mxu1 %v1725_v20 }
 0x62f   :  { %1727 = vmatprep.subr.bf16.mxu1 %v1766_v0 }
 0x632   :  { %1729 = vmatpush3.bf16.msra.mxu1 %v1728_v23 }
 0x633   :  { %1730 = vmatprep.subr.bf16.mxu1 %v1766_v0 }
 0x636   :  { %1732 = vmatpush3.bf16.msra.mxu1 %v1731_v31 }
 0x6ec   :  { %v767_v25 = vpop.f32.mrb[6].mxu1 }
 0x6ed   :  { %v768_v26 = vadd.f32 %v970_v24, %v767_v25  ;;  %v1422_v27 = vpop.f32.mrb[7].mxu1 }
 0x6ef   :  { %v771_v28 = vmax.f32 %v768_v26, 0.0 }
 0x6f1   :  { %1456 = vmatmul.mubr.f32.vlgmr.msra.gmra.mrb[8].mxu0 %v771_v28 }
 0x7c4   :  { %v860_v33 = vpop.f32.mrb[8].mxu0 }
 0x7c5   :  { %v861_v34 = vadd.f32 %v971_v32, %v860_v33  ;;  %v1457_v0 = vpop.f32.mrb[9].mxu0 }
 0x7c7   :  { %v864_v35 = vmax.f32 %v861_v34, 0.0 }
 0x7c9   :  { %1491 = vmatmul.mubr.f32.vlgmr.msra.gmra.mrb[8].mxu1 %v864_v35 }
 0x89c   :  { %v953_v37 = vpop.f32.mrb[8].mxu1 }
 0x89d   :  { %v954_v38 = vadd.f32 %v972_v36, %v953_v37  ;;  %v1492_v39 = vpop.f32.mrb[9].mxu1 }
 0x89f   :  { %957 = vst [vmem:[%s1946_s3 + $0x10] sm:$0xff] %v954_v38 }
 0x8a0   :  { %962 = vsyncpa [#allocation3], 1 }

</bundles_post_ra>
